<compile_context>
chip_gen: v5e
topology: v5e:2x2
jax: 0.10.0
libtpu: 0.0.40
codegen_flags: <defaults>
</compile_context>

<pallas_src>
import jax
import jax.numpy as jnp
from jax.experimental import pallas as pl
from jax.experimental.pallas import tpu as pltpu


def _pos_emb_kernel(table_ref, out_ref):
    # table_ref: (seq_tile, dim_tile)            tile of the embedding table
    # out_ref:   (batch_tile, seq_tile, dim_tile) tile of the output
    tile = table_ref[...]
    # Unrolled per-batch store: table tile vregs loaded once, stored
    # batch_tile times (store slot is the only vector work in this kernel).
    for b in range(out_ref.shape[0]):
        out_ref[b] = tile


def _round_up(x, m):
    return ((x + m - 1) // m) * m


def positional_embedding(inputs, table, *,
                         max_seq_tile=256,
                         max_dim_tile=2048,
                         table_tile_budget_bytes=2 << 20,
                         out_block_budget_bytes=8 << 20):
    """Positional-embedding forward.

    inputs: (bsz, seq_len) token ids -- only the shape is used (positions are
            arange(seq_len), exactly as in the PyTorch module).
    table:  (num_embeddings, embedding_dim) embedding weight.
    returns (bsz, seq_len, embedding_dim) == broadcast of table[:seq_len].
    """
    bsz, seq_len = inputs.shape[:2]
    num_embeddings, dim = table.shape
    assert seq_len <= num_embeddings, "seq_len exceeds positional table size"

    itemsize = jnp.dtype(table.dtype).itemsize
    # Minimum sublane tile for this dtype (f32: 8, bf16: 16, int8/fp8: 32).
    sublane = 8 * max(1, 4 // itemsize)

    # ---- tile selection -----------------------------------------------------
    # Dim (lane) tile: take the full dim whenever a minimal-height slab fits
    # the output budget (longest contiguous write-back rows); otherwise a
    # lane-dense multiple of 128.
    if dim * itemsize * sublane <= out_block_budget_bytes and dim <= max_dim_tile:
        dim_tile = dim
    else:
        dim_tile = min(_round_up(dim, 128), (max_dim_tile // 128) * 128)
        if dim_tile > dim:          # dim < 128: full dim is always a legal block
            dim_tile = dim

    # Seq (sublane) tile: multiple of the dtype sublane tile, capped so one
    # (seq_tile, dim_tile) table slab stays within its budget.
    rows_budget = max(sublane, (table_tile_budget_bytes // (dim_tile * itemsize)))
    rows_budget = max(sublane, (rows_budget // sublane) * sublane)
    seq_tile = min(_round_up(seq_len, sublane),
                   rows_budget,
                   _round_up(max_seq_tile, sublane))
    seq_tile = max(seq_tile, sublane)

    # Batch folding: let the byte budget decide (amortizes per-grid-step
    # overhead).  Hard cap of 64 only bounds the unrolled store loop /
    # compile time, not the byte budget for realistic shapes.
    slab_bytes = seq_tile * dim_tile * itemsize
    batch_tile = max(1, min(bsz, 64, out_block_budget_bytes // max(slab_bytes, 1)))

    s_tiles = pl.cdiv(seq_len, seq_tile)
    d_tiles = pl.cdiv(dim, dim_tile)
    b_tiles = pl.cdiv(bsz, batch_tile)

    # Batch innermost: the table tile's block index is constant across the
    # inner batch loop, so it is fetched from HBM once per (s, d) tile.
    # Put the axis with the most tiles first (helps the v7x two-TC split).
    if d_tiles > s_tiles:
        grid = (d_tiles, s_tiles, b_tiles)
        tab_map = lambda d, s, b: (s, d)
        out_map = lambda d, s, b: (b, s, d)
    else:
        grid = (s_tiles, d_tiles, b_tiles)
        tab_map = lambda s, d, b: (s, d)
        out_map = lambda s, d, b: (b, s, d)

    # Explicit VMEM limit: covers double-buffered input tile + output block on
    # every generation (v5e scoped default is only 16 MiB; v7x physical 64 MiB).
    in_bytes = seq_tile * dim_tile * itemsize
    out_bytes = batch_tile * in_bytes
    vmem_limit_bytes = int(min(max(2 * (in_bytes + out_bytes) + (2 << 20),
                                   16 << 20),
                               40 << 20))

    out_shape = jax.ShapeDtypeStruct((bsz, seq_len, dim), table.dtype)

    return pl.pallas_call(
        _pos_emb_kernel,
        out_shape=out_shape,
        grid_spec=pltpu.PrefetchScalarGridSpec(
            num_scalar_prefetch=0,
            grid=grid,
            in_specs=[
                # position_ids == arange(seq_len): the "gather" is a contiguous
                # tiled read of the first seq_len rows of the table; its block
                # index ignores the innermost batch axis (VMEM tile reuse).
                pl.BlockSpec((seq_tile, dim_tile), tab_map),
            ],
            out_specs=pl.BlockSpec((batch_tile, seq_tile, dim_tile), out_map),
        ),
        compiler_params=pltpu.CompilerParams(
            # Pure broadcast copy, no reduction axis: every grid axis is
            # independent -> allow the v7x two-TC split (no-op on v5e/v6e).
            dimension_semantics=("parallel", "parallel", "parallel"),
            vmem_limit_bytes=vmem_limit_bytes,
        ),
        cost_estimate=pl.CostEstimate(
            flops=0,
            transcendentals=0,
            bytes_accessed=int((bsz + 1) * seq_len * dim * itemsize),
        ),
    )(table)


if __name__ == "__main__":
    key = jax.random.PRNGKey(0)
    k_tab, k_ids = jax.random.split(key)

    # Small shapes consistent with the module's forward.
    bsz, seq_len = 2, 8
    num_embeddings, embedding_dim = 16, 128

    # Deterministic parameter init (nn.Embedding default: N(0, 1)).
    table = jax.random.normal(
        k_tab, (num_embeddings, embedding_dim), dtype=jnp.float32)
    # Token-id input; only its shape is used by the forward pass.
    x = jax.random.randint(k_ids, (bsz, seq_len), 0, num_embeddings,
                           dtype=jnp.int32)

    out = jax.block_until_ready(positional_embedding(x, table))
    ref = jnp.broadcast_to(table[:seq_len][None, :, :],
                           (bsz, seq_len, embedding_dim))
    assert out.shape == (bsz, seq_len, embedding_dim)
    assert jnp.allclose(out, ref)

    # Non-sublane-aligned seq_len (edge-block masking check from review).
    seq_len2 = 10
    x2 = jax.random.randint(k_ids, (bsz, seq_len2), 0, num_embeddings,
                            dtype=jnp.int32)
    out2 = jax.block_until_ready(positional_embedding(x2, table))
    ref2 = jnp.broadcast_to(table[:seq_len2][None, :, :],
                            (bsz, seq_len2, embedding_dim))
    assert out2.shape == (bsz, seq_len2, embedding_dim)
    assert jnp.allclose(out2, ref2)

    print("KERNEL_OK")
</pallas_src>

<mosaic_0001>
module attributes {stable_mosaic.version = 11 : i64} {
  func.func @_pos_emb_kernel(%arg0: i32, %arg1: i32, %arg2: i32, %arg3: memref<8x128xf32, #tpu.memory_space<vmem>>, %arg4: memref<2x8x128xf32, #tpu.memory_space<vmem>>) attributes {dimension_semantics = [#tpu.dimension_semantics<parallel>, #tpu.dimension_semantics<parallel>, #tpu.dimension_semantics<parallel>], iteration_bounds = array<i64: 1, 1, 1>, scalar_prefetch = 0 : i64, scratch_operands = 0 : i64, tpu.core_type = #tpu.core_type<tc>, window_params = [{transform_indices = @transform_0, window_bounds = array<i64: 8, 128>}, {transform_indices = @transform_1, window_bounds = array<i64: 2, 8, 128>}]} {
    %c0 = arith.constant 0 : index
    %c0_0 = arith.constant 0 : index
    %0 = vector.load %arg3[%c0, %c0_0] : memref<8x128xf32, #tpu.memory_space<vmem>>, vector<8x128xf32>
    %c0_1 = arith.constant 0 : index
    %c0_2 = arith.constant 0 : index
    %c0_3 = arith.constant 0 : index
    %1 = vector.load %arg4[%c0_1, %c0_2, %c0_3] : memref<2x8x128xf32, #tpu.memory_space<vmem>>, vector<1x8x128xf32>
    %2 = vector.shape_cast %1 : vector<1x8x128xf32> to vector<8x128xf32>
    %3 = vector.shape_cast %0 : vector<8x128xf32> to vector<1x8x128xf32>
    tpu.vector_store %arg4[%c0_1, %c0_2, %c0_3], %3 {strides = array<i32>} : memref<2x8x128xf32, #tpu.memory_space<vmem>>, vector<1x8x128xf32>,
    %c1 = arith.constant 1 : index
    %c0_4 = arith.constant 0 : index
    %c0_5 = arith.constant 0 : index
    %4 = vector.load %arg4[%c1, %c0_4, %c0_5] : memref<2x8x128xf32, #tpu.memory_space<vmem>>, vector<1x8x128xf32>
    %5 = vector.shape_cast %4 : vector<1x8x128xf32> to vector<8x128xf32>
    %6 = vector.shape_cast %0 : vector<8x128xf32> to vector<1x8x128xf32>
    tpu.vector_store %arg4[%c1, %c0_4, %c0_5], %6 {strides = array<i32>} : memref<2x8x128xf32, #tpu.memory_space<vmem>>, vector<1x8x128xf32>,
    return
  }
  func.func @transform_0(%arg0: i32, %arg1: i32, %arg2: i32) -> (i32, i32) {
    %c0_i32 = arith.constant 0 : i32
    return %arg0, %arg1 : i32, i32
  }
  func.func @transform_1(%arg0: i32, %arg1: i32, %arg2: i32) -> (i32, i32, i32) {
    %c0_i32 = arith.constant 0 : i32
    return %arg2, %arg0, %arg1 : i32, i32, i32
  }
}

</mosaic_0001>

<bundles_post_ra>
// kernel: tpu_custom_call.1
= control target key start
LH: loop header
LB: loop body
LE: loop exit
PB: predicated region body
PF: predicated region fallthrough
CT: control target
= control target key end

     0   :  { %6 = vsyncpa [#allocation3], 0  ;;  %s122_s0 = inlined_call_operand.hbm [shape: f32[16,128], index: 0, kind: input, shape index: {}]   ;;  %s123_s1 = inlined_call_operand.hbm [shape: f32[2,8,128], index: 1, kind: output, shape index: {}]  }
   0x1   :  { %7 = vsyncpa [#allocation4], 0  ;;  %s13_s8 = sshll.u32 %s122_s0, 4  ;;  %s102_s9 = smov [#allocation2]   ;;  %s14_s8 = int_to_ptr.hbm [resolvable:$true] %s13_s8 }
   0x2   :  { %s15_s10 = sshll.u32 %s102_s9, 4  ;;  %s16_s10 = int_to_ptr.vmem [resolvable:$true] %s15_s10 }
   0x3   :  { %18 = dma.hbm_to_vmem [thread:$0]  %s14_s8, 128, %s16_s10, [#allocation3]  }
   0x4   :  { %98 = dma.done.wait [#allocation3], 128  }
   0x5   :  { %99 = vsyncadd [#allocation3], 4294967168  ;;  %s103_s11 = smov [#allocation5]   ;;  %s33_s15 = sshll.u32 %s123_s1, 4  ;;  %v23_v0 = vld [vmem:[#allocation2] sm:$0xff]  ;;  %s34_s15 = int_to_ptr.hbm [resolvable:$true] %s33_s15 }
   0x6   :  { %s31_s12 = sshll.u32 %s103_s11, 4  ;;  %24 = vst [vmem:[#allocation5] sm:$0xff] %v23_v0  ;;  %s104_s16 = smov 128   ;;  %s32_s12 = int_to_ptr.vmem [resolvable:$true] %s31_s12 }
   0x7   :  { %26 = vst [vmem:[#allocation5 + $0x8] sm:$0xff] %v23_v0  ;;  %s105_s0 = smov 8  }
   0x8   :  { %39 = dma.vmem_to_hbm [thread:$0]  %s32_s12, 256, %s34_s15, [#allocation4], %s104_s16, %s104_s16, %s105_s0  }
   0x9   :  { %100 = dma.done.wait [#allocation4], 256  }
   0xa   :  { %101 = vsyncadd [#allocation4], 4294967040 }
   0xb   :  { %44 = vsyncpa [#allocation3], 1 }
   0xc   :  { %45 = vsyncpa [#allocation4], 1 }

</bundles_post_ra>
